<compile_context>
chip_gen: v5e
topology: v5e:2x2
jax: 0.10.0
libtpu: 0.0.40
codegen_flags: <defaults>
</compile_context>

<pallas_src>
import jax
import jax.numpy as jnp
from jax import lax
from jax.experimental import pallas as pl
from jax.experimental.pallas import tpu as pltpu

NUM_HEADS = 7       # len(layers_for_pred) = len([1, 3, 5, 7, 9, 11, 12])
NUM_CLASSES = 3


def asba_head_kernel(cls_ref, wp_ref, bp_ref, wc_ref, bc_ref, labels_ref,
                     loss_ref, logits_ref):
    """All 7 heads (pooler + clf + CE loss) in one invocation, unrolled."""
    num_layers = cls_ref.shape[0]
    batch, num_classes = logits_ref.shape

    # One-hot mask built once in-kernel from int labels (no wrapper one_hot).
    class_ids = lax.broadcasted_iota(jnp.int32, (batch, num_classes), 1)
    onehot = (class_ids == labels_ref[...]).astype(jnp.float32)        # (B, C)

    logit_sum = jnp.zeros((batch, num_classes), jnp.float32)
    logprob_sum = jnp.zeros((batch, num_classes), jnp.float32)

    for l in range(num_layers):                 # static unroll, L = 7
        cls = cls_ref[l]                        # (B, H) bf16

        # Pooler: tanh(x @ Wp^T + bp) -- bf16 MXU operands, f32 accumulation;
        # tanh stays f32 (v5e has no bf16 VPU/EUP path).
        pooled = jnp.tanh(
            jnp.dot(cls, wp_ref[l], preferred_element_type=jnp.float32)
            + bp_ref[l])                        # (B, H) f32

        # Classifier: lane-dense (C, H) weight, contract on H (minor axis of
        # both operands) -> (B, C).  Tiny matmul, kept in f32.
        logit = lax.dot_general(
            pooled, wc_ref[l], (((1,), (1,)), ((), ())),
            preferred_element_type=jnp.float32) + bc_ref[l]            # (B, C)

        # CrossEntropyLoss pieces; the actual reduce is deferred past the loop.
        m = jnp.max(logit, axis=-1, keepdims=True)
        lse = m + jnp.log(jnp.sum(jnp.exp(logit - m), axis=-1, keepdims=True))
        logprob_sum = logprob_sum + (logit - lse)
        logit_sum = logit_sum + logit

    # sum_l mean_b[-sum_c onehot * log_softmax_l]  ==  full reduce of the
    # layer-summed log-probs masked by the (layer-invariant) one-hot, / B.
    loss_ref[0] = jnp.sum(-onehot * logprob_sum) / batch
    logits_ref[...] = logit_sum / num_layers


def _cost_estimate(num_layers, batch, hidden, num_classes):
    flops = 2 * num_layers * batch * hidden * (hidden + num_classes)
    transcendentals = num_layers * batch * (hidden + num_classes + 1)
    bytes_accessed = (num_layers * batch * hidden * 2        # cls bf16
                      + num_layers * hidden * hidden * 2     # Wp bf16
                      + num_layers * hidden * 4              # bp
                      + num_layers * num_classes * hidden * 4  # Wc
                      + num_layers * num_classes * 4          # bc
                      + batch * 4                             # labels
                      + batch * num_classes * 4 + 4)          # outputs
    return pl.CostEstimate(flops=flops, transcendentals=transcendentals,
                           bytes_accessed=bytes_accessed)


@jax.jit
def asba_heads_forward(encodings, wp_bf16, bp, wc, bc, label_ids):
    """encodings: (L, B, S, H) f32; wp_bf16: (L, H, H) bf16 (pre-cast param);
       bp: (L, 1, H) f32; wc: (L, C, H) f32 lane-dense; bc: (L, 1, C) f32;
       label_ids: (B,) int."""
    L, B, S, H = encodings.shape

    # CLS slice + bf16 cast: fuses into one tiny XLA op under jit (reads only
    # the L*B CLS rows).  NOTE: assumes B % 8 == 0 (sublane tiling).
    cls = encodings[:, :, 0, :].astype(jnp.bfloat16)           # (L, B, H)
    labels = label_ids.astype(jnp.int32).reshape(B, 1)         # (B, 1)

    vmem = pl.BlockSpec(memory_space=pltpu.MemorySpace.VMEM)
    smem = pl.BlockSpec(memory_space=pltpu.MemorySpace.SMEM)

    loss, logits = pl.pallas_call(
        asba_head_kernel,
        out_shape=(jax.ShapeDtypeStruct((1,), jnp.float32),
                   jax.ShapeDtypeStruct((B, NUM_CLASSES), jnp.float32)),
        in_specs=[vmem, vmem, vmem, vmem, vmem, vmem],
        out_specs=(smem, vmem),
        cost_estimate=_cost_estimate(L, B, H, NUM_CLASSES),
    )(cls, wp_bf16, bp, wc, bc, labels)
    return loss[0], logits


def reference_forward(encodings, wp_bf16, bp, wc, bc, label_ids):
    """Pure-JAX reference mirroring the PyTorch head-forward semantics.

    Applies the same bf16 rounding to the pooler-matmul operands as the kernel
    (kernel accumulates in f32, so results agree to ~f32 precision)."""
    cls = encodings[:, :, 0, :].astype(jnp.bfloat16).astype(jnp.float32)
    wp = wp_bf16.astype(jnp.float32)
    pooled = jnp.tanh(jnp.einsum('lbh,lhk->lbk', cls, wp) + bp)   # (L, B, H)
    logits = jnp.einsum('lbh,lch->lbc', pooled, wc) + bc          # (L, B, 3)
    onehot = jax.nn.one_hot(label_ids, NUM_CLASSES, dtype=jnp.float32)
    log_probs = jax.nn.log_softmax(logits, axis=-1)
    per_layer_loss = jnp.mean(jnp.sum(-onehot[None] * log_probs, axis=-1),
                              axis=-1)                            # (L,)
    return jnp.sum(per_layer_loss), jnp.mean(logits, axis=0)


if __name__ == "__main__":
    B, S, H = 8, 16, 128      # small shapes; HIDDEN_SIZE=128 stand-in
    LAMBDA = 0.5              # cfg.MODEL.LAMBDA (scalar glue, see TODO above)

    key = jax.random.PRNGKey(0)
    k_enc, k_wp, k_bp, k_wc, k_bc, k_lab = jax.random.split(key, 6)

    # Stand-in for DeBERTa hidden states at the 7 selected layers.
    encodings = jax.random.normal(k_enc, (NUM_HEADS, B, S, H), jnp.float32)

    # Parameters.  Pooler weight stored pre-transposed (x @ Wp^T) and pre-cast
    # to bf16 ONCE here (parameter/checkpoint cast, NOT a per-call op).
    wp_t = 0.05 * jax.random.normal(k_wp, (NUM_HEADS, H, H), jnp.float32)
    wp_bf16 = wp_t.astype(jnp.bfloat16)
    bp = 0.05 * jax.random.normal(k_bp, (NUM_HEADS, 1, H), jnp.float32)
    # Classifier weight kept in its native nn.Linear layout W[out=3, in=H]:
    # lane-dense (H=128 on the lane axis).
    wc = 0.05 * jax.random.normal(k_wc, (NUM_HEADS, NUM_CLASSES, H),
                                  jnp.float32)
    bc = 0.05 * jax.random.normal(k_bc, (NUM_HEADS, 1, NUM_CLASSES),
                                  jnp.float32)
    label_ids = jax.random.randint(k_lab, (B,), 0, NUM_CLASSES, jnp.int32)

    loss, logits = asba_heads_forward(encodings, wp_bf16, bp, wc, bc,
                                      label_ids)
    loss = jax.block_until_ready(loss)
    logits = jax.block_until_ready(logits)

    # `input_embedding is not None` branch: scaled loss (glue).
    scaled_loss = loss * LAMBDA

    ref_loss, ref_logits = reference_forward(encodings, wp_bf16, bp, wc, bc,
                                             label_ids)
    assert jnp.allclose(loss, ref_loss, atol=1e-4, rtol=1e-4), (loss, ref_loss)
    assert jnp.allclose(logits, ref_logits, atol=1e-4, rtol=1e-4)
    assert jnp.isfinite(scaled_loss)

    print("KERNEL_OK")
</pallas_src>

<mosaic_0001>
module attributes {stable_mosaic.version = 11 : i64} {
  func.func @asba_head_kernel(%arg0: memref<7x8x128xbf16, #tpu.memory_space<vmem>>, %arg1: memref<7x128x128xbf16, #tpu.memory_space<vmem>>, %arg2: memref<7x1x128xf32, #tpu.memory_space<vmem>>, %arg3: memref<7x3x128xf32, #tpu.memory_space<vmem>>, %arg4: memref<7x1x3xf32, #tpu.memory_space<vmem>>, %arg5: memref<8x1xi32, #tpu.memory_space<vmem>>, %arg6: memref<1xf32, #tpu.memory_space<smem>>, %arg7: memref<8x3xf32, #tpu.memory_space<vmem>>) attributes {dimension_semantics = [], scalar_prefetch = 0 : i64, scratch_operands = 0 : i64, tpu.core_type = #tpu.core_type<tc>} {
    %0 = tpu.iota {dimensions = array<i32: 1>} : vector<8x3xi32>
    %c0 = arith.constant 0 : index
    %c0_0 = arith.constant 0 : index
    %1 = vector.load %arg5[%c0, %c0_0] : memref<8x1xi32, #tpu.memory_space<vmem>>, vector<8x1xi32>
    %2 = vector.broadcast %1 : vector<8x1xi32> to vector<8x3xi32>
    %3 = arith.cmpi eq, %0, %2 : vector<8x3xi32>
    %4 = arith.extui %3 : vector<8x3xi1> to vector<8x3xi32>
    %5 = arith.sitofp %4 : vector<8x3xi32> to vector<8x3xf32>
    %cst = arith.constant 0.000000e+00 : f32
    %6 = vector.broadcast %cst : f32 to vector<8x3xf32>
    %cst_1 = arith.constant 0.000000e+00 : f32
    %7 = vector.broadcast %cst_1 : f32 to vector<8x3xf32>
    %c0_2 = arith.constant 0 : index
    %c0_3 = arith.constant 0 : index
    %c0_4 = arith.constant 0 : index
    %8 = vector.load %arg0[%c0_2, %c0_3, %c0_4] : memref<7x8x128xbf16, #tpu.memory_space<vmem>>, vector<1x8x128xbf16>
    %9 = vector.shape_cast %8 : vector<1x8x128xbf16> to vector<8x128xbf16>
    %c0_5 = arith.constant 0 : index
    %c0_6 = arith.constant 0 : index
    %c0_7 = arith.constant 0 : index
    %10 = vector.load %arg1[%c0_5, %c0_6, %c0_7] : memref<7x128x128xbf16, #tpu.memory_space<vmem>>, vector<1x128x128xbf16>
    %11 = vector.shape_cast %10 : vector<1x128x128xbf16> to vector<128x128xbf16>
    %cst_8 = arith.constant dense<0.000000e+00> : vector<8x128xf32>
    %12 = tpu.matmul %9, %11, %cst_8 {dimension_numbers = #tpu.dot_dimension_numbers<[1], [0], [0], [1], [0, 0, 1, 1], [], []>} : vector<8x128xbf16>, vector<128x128xbf16>, vector<8x128xf32> -> vector<8x128xf32>
    %c0_9 = arith.constant 0 : index
    %c0_10 = arith.constant 0 : index
    %c0_11 = arith.constant 0 : index
    %13 = vector.load %arg2[%c0_9, %c0_10, %c0_11] : memref<7x1x128xf32, #tpu.memory_space<vmem>>, vector<1x1x128xf32>
    %14 = vector.shape_cast %13 : vector<1x1x128xf32> to vector<1x128xf32>
    %15 = vector.broadcast %14 : vector<1x128xf32> to vector<8x128xf32>
    %16 = arith.addf %12, %15 : vector<8x128xf32>
    %17 = math.tanh %16 : vector<8x128xf32>
    %c0_12 = arith.constant 0 : index
    %c0_13 = arith.constant 0 : index
    %c0_14 = arith.constant 0 : index
    %18 = vector.load %arg3[%c0_12, %c0_13, %c0_14] : memref<7x3x128xf32, #tpu.memory_space<vmem>>, vector<1x3x128xf32>
    %19 = vector.shape_cast %18 : vector<1x3x128xf32> to vector<3x128xf32>
    %cst_15 = arith.constant dense<0.000000e+00> : vector<8x3xf32>
    %20 = tpu.matmul %17, %19, %cst_15 {dimension_numbers = #tpu.dot_dimension_numbers<[1], [1], [0], [0], [0, 0, 1, 0], [], []>} : vector<8x128xf32>, vector<3x128xf32>, vector<8x3xf32> -> vector<8x3xf32>
    %c0_16 = arith.constant 0 : index
    %c0_17 = arith.constant 0 : index
    %c0_18 = arith.constant 0 : index
    %21 = vector.load %arg4[%c0_16, %c0_17, %c0_18] : memref<7x1x3xf32, #tpu.memory_space<vmem>>, vector<1x1x3xf32>
    %22 = vector.shape_cast %21 : vector<1x1x3xf32> to vector<1x3xf32>
    %23 = vector.broadcast %22 : vector<1x3xf32> to vector<8x3xf32>
    %24 = arith.addf %20, %23 : vector<8x3xf32>
    %cst_19 = arith.constant dense<0xFF800000> : vector<8xf32>
    %25 = vector.multi_reduction <maximumf>, %24, %cst_19 [1] : vector<8x3xf32> to vector<8xf32>
    %26 = vector.shape_cast %25 : vector<8xf32> to vector<8x1xf32>
    %27 = vector.broadcast %26 : vector<8x1xf32> to vector<8x3xf32>
    %28 = arith.subf %24, %27 : vector<8x3xf32>
    %29 = math.exp %28 : vector<8x3xf32>
    %cst_20 = arith.constant dense<0.000000e+00> : vector<8xf32>
    %30 = vector.multi_reduction <add>, %29, %cst_20 [1] : vector<8x3xf32> to vector<8xf32>
    %31 = vector.shape_cast %30 : vector<8xf32> to vector<8x1xf32>
    %32 = math.log %31 : vector<8x1xf32>
    %33 = arith.addf %26, %32 : vector<8x1xf32>
    %34 = vector.broadcast %33 : vector<8x1xf32> to vector<8x3xf32>
    %35 = arith.subf %24, %34 : vector<8x3xf32>
    %36 = arith.addf %7, %35 : vector<8x3xf32>
    %37 = arith.addf %6, %24 : vector<8x3xf32>
    %c1 = arith.constant 1 : index
    %c0_21 = arith.constant 0 : index
    %c0_22 = arith.constant 0 : index
    %38 = vector.load %arg0[%c1, %c0_21, %c0_22] : memref<7x8x128xbf16, #tpu.memory_space<vmem>>, vector<1x8x128xbf16>
    %39 = vector.shape_cast %38 : vector<1x8x128xbf16> to vector<8x128xbf16>
    %c1_23 = arith.constant 1 : index
    %c0_24 = arith.constant 0 : index
    %c0_25 = arith.constant 0 : index
    %40 = vector.load %arg1[%c1_23, %c0_24, %c0_25] : memref<7x128x128xbf16, #tpu.memory_space<vmem>>, vector<1x128x128xbf16>
    %41 = vector.shape_cast %40 : vector<1x128x128xbf16> to vector<128x128xbf16>
    %cst_26 = arith.constant dense<0.000000e+00> : vector<8x128xf32>
    %42 = tpu.matmul %39, %41, %cst_26 {dimension_numbers = #tpu.dot_dimension_numbers<[1], [0], [0], [1], [0, 0, 1, 1], [], []>} : vector<8x128xbf16>, vector<128x128xbf16>, vector<8x128xf32> -> vector<8x128xf32>
    %c1_27 = arith.constant 1 : index
    %c0_28 = arith.constant 0 : index
    %c0_29 = arith.constant 0 : index
    %43 = vector.load %arg2[%c1_27, %c0_28, %c0_29] : memref<7x1x128xf32, #tpu.memory_space<vmem>>, vector<1x1x128xf32>
    %44 = vector.shape_cast %43 : vector<1x1x128xf32> to vector<1x128xf32>
    %45 = vector.broadcast %44 : vector<1x128xf32> to vector<8x128xf32>
    %46 = arith.addf %42, %45 : vector<8x128xf32>
    %47 = math.tanh %46 : vector<8x128xf32>
    %c1_30 = arith.constant 1 : index
    %c0_31 = arith.constant 0 : index
    %c0_32 = arith.constant 0 : index
    %48 = vector.load %arg3[%c1_30, %c0_31, %c0_32] : memref<7x3x128xf32, #tpu.memory_space<vmem>>, vector<1x3x128xf32>
    %49 = vector.shape_cast %48 : vector<1x3x128xf32> to vector<3x128xf32>
    %cst_33 = arith.constant dense<0.000000e+00> : vector<8x3xf32>
    %50 = tpu.matmul %47, %49, %cst_33 {dimension_numbers = #tpu.dot_dimension_numbers<[1], [1], [0], [0], [0, 0, 1, 0], [], []>} : vector<8x128xf32>, vector<3x128xf32>, vector<8x3xf32> -> vector<8x3xf32>
    %c1_34 = arith.constant 1 : index
    %c0_35 = arith.constant 0 : index
    %c0_36 = arith.constant 0 : index
    %51 = vector.load %arg4[%c1_34, %c0_35, %c0_36] : memref<7x1x3xf32, #tpu.memory_space<vmem>>, vector<1x1x3xf32>
    %52 = vector.shape_cast %51 : vector<1x1x3xf32> to vector<1x3xf32>
    %53 = vector.broadcast %52 : vector<1x3xf32> to vector<8x3xf32>
    %54 = arith.addf %50, %53 : vector<8x3xf32>
    %cst_37 = arith.constant dense<0xFF800000> : vector<8xf32>
    %55 = vector.multi_reduction <maximumf>, %54, %cst_37 [1] : vector<8x3xf32> to vector<8xf32>
    %56 = vector.shape_cast %55 : vector<8xf32> to vector<8x1xf32>
    %57 = vector.broadcast %56 : vector<8x1xf32> to vector<8x3xf32>
    %58 = arith.subf %54, %57 : vector<8x3xf32>
    %59 = math.exp %58 : vector<8x3xf32>
    %cst_38 = arith.constant dense<0.000000e+00> : vector<8xf32>
    %60 = vector.multi_reduction <add>, %59, %cst_38 [1] : vector<8x3xf32> to vector<8xf32>
    %61 = vector.shape_cast %60 : vector<8xf32> to vector<8x1xf32>
    %62 = math.log %61 : vector<8x1xf32>
    %63 = arith.addf %56, %62 : vector<8x1xf32>
    %64 = vector.broadcast %63 : vector<8x1xf32> to vector<8x3xf32>
    %65 = arith.subf %54, %64 : vector<8x3xf32>
    %66 = arith.addf %36, %65 : vector<8x3xf32>
    %67 = arith.addf %37, %54 : vector<8x3xf32>
    %c2 = arith.constant 2 : index
    %c0_39 = arith.constant 0 : index
    %c0_40 = arith.constant 0 : index
    %68 = vector.load %arg0[%c2, %c0_39, %c0_40] : memref<7x8x128xbf16, #tpu.memory_space<vmem>>, vector<1x8x128xbf16>
    %69 = vector.shape_cast %68 : vector<1x8x128xbf16> to vector<8x128xbf16>
    %c2_41 = arith.constant 2 : index
    %c0_42 = arith.constant 0 : index
    %c0_43 = arith.constant 0 : index
    %70 = vector.load %arg1[%c2_41, %c0_42, %c0_43] : memref<7x128x128xbf16, #tpu.memory_space<vmem>>, vector<1x128x128xbf16>
    %71 = vector.shape_cast %70 : vector<1x128x128xbf16> to vector<128x128xbf16>
    %cst_44 = arith.constant dense<0.000000e+00> : vector<8x128xf32>
    %72 = tpu.matmul %69, %71, %cst_44 {dimension_numbers = #tpu.dot_dimension_numbers<[1], [0], [0], [1], [0, 0, 1, 1], [], []>} : vector<8x128xbf16>, vector<128x128xbf16>, vector<8x128xf32> -> vector<8x128xf32>
    %c2_45 = arith.constant 2 : index
    %c0_46 = arith.constant 0 : index
    %c0_47 = arith.constant 0 : index
    %73 = vector.load %arg2[%c2_45, %c0_46, %c0_47] : memref<7x1x128xf32, #tpu.memory_space<vmem>>, vector<1x1x128xf32>
    %74 = vector.shape_cast %73 : vector<1x1x128xf32> to vector<1x128xf32>
    %75 = vector.broadcast %74 : vector<1x128xf32> to vector<8x128xf32>
    %76 = arith.addf %72, %75 : vector<8x128xf32>
    %77 = math.tanh %76 : vector<8x128xf32>
    %c2_48 = arith.constant 2 : index
    %c0_49 = arith.constant 0 : index
    %c0_50 = arith.constant 0 : index
    %78 = vector.load %arg3[%c2_48, %c0_49, %c0_50] : memref<7x3x128xf32, #tpu.memory_space<vmem>>, vector<1x3x128xf32>
    %79 = vector.shape_cast %78 : vector<1x3x128xf32> to vector<3x128xf32>
    %cst_51 = arith.constant dense<0.000000e+00> : vector<8x3xf32>
    %80 = tpu.matmul %77, %79, %cst_51 {dimension_numbers = #tpu.dot_dimension_numbers<[1], [1], [0], [0], [0, 0, 1, 0], [], []>} : vector<8x128xf32>, vector<3x128xf32>, vector<8x3xf32> -> vector<8x3xf32>
    %c2_52 = arith.constant 2 : index
    %c0_53 = arith.constant 0 : index
    %c0_54 = arith.constant 0 : index
    %81 = vector.load %arg4[%c2_52, %c0_53, %c0_54] : memref<7x1x3xf32, #tpu.memory_space<vmem>>, vector<1x1x3xf32>
    %82 = vector.shape_cast %81 : vector<1x1x3xf32> to vector<1x3xf32>
    %83 = vector.broadcast %82 : vector<1x3xf32> to vector<8x3xf32>
    %84 = arith.addf %80, %83 : vector<8x3xf32>
    %cst_55 = arith.constant dense<0xFF800000> : vector<8xf32>
    %85 = vector.multi_reduction <maximumf>, %84, %cst_55 [1] : vector<8x3xf32> to vector<8xf32>
    %86 = vector.shape_cast %85 : vector<8xf32> to vector<8x1xf32>
    %87 = vector.broadcast %86 : vector<8x1xf32> to vector<8x3xf32>
    %88 = arith.subf %84, %87 : vector<8x3xf32>
    %89 = math.exp %88 : vector<8x3xf32>
    %cst_56 = arith.constant dense<0.000000e+00> : vector<8xf32>
    %90 = vector.multi_reduction <add>, %89, %cst_56 [1] : vector<8x3xf32> to vector<8xf32>
    %91 = vector.shape_cast %90 : vector<8xf32> to vector<8x1xf32>
    %92 = math.log %91 : vector<8x1xf32>
    %93 = arith.addf %86, %92 : vector<8x1xf32>
    %94 = vector.broadcast %93 : vector<8x1xf32> to vector<8x3xf32>
    %95 = arith.subf %84, %94 : vector<8x3xf32>
    %96 = arith.addf %66, %95 : vector<8x3xf32>
    %97 = arith.addf %67, %84 : vector<8x3xf32>
    %c3 = arith.constant 3 : index
    %c0_57 = arith.constant 0 : index
    %c0_58 = arith.constant 0 : index
    %98 = vector.load %arg0[%c3, %c0_57, %c0_58] : memref<7x8x128xbf16, #tpu.memory_space<vmem>>, vector<1x8x128xbf16>
    %99 = vector.shape_cast %98 : vector<1x8x128xbf16> to vector<8x128xbf16>
    %c3_59 = arith.constant 3 : index
    %c0_60 = arith.constant 0 : index
    %c0_61 = arith.constant 0 : index
    %100 = vector.load %arg1[%c3_59, %c0_60, %c0_61] : memref<7x128x128xbf16, #tpu.memory_space<vmem>>, vector<1x128x128xbf16>
    %101 = vector.shape_cast %100 : vector<1x128x128xbf16> to vector<128x128xbf16>
    %cst_62 = arith.constant dense<0.000000e+00> : vector<8x128xf32>
    %102 = tpu.matmul %99, %101, %cst_62 {dimension_numbers = #tpu.dot_dimension_numbers<[1], [0], [0], [1], [0, 0, 1, 1], [], []>} : vector<8x128xbf16>, vector<128x128xbf16>, vector<8x128xf32> -> vector<8x128xf32>
    %c3_63 = arith.constant 3 : index
    %c0_64 = arith.constant 0 : index
    %c0_65 = arith.constant 0 : index
    %103 = vector.load %arg2[%c3_63, %c0_64, %c0_65] : memref<7x1x128xf32, #tpu.memory_space<vmem>>, vector<1x1x128xf32>
    %104 = vector.shape_cast %103 : vector<1x1x128xf32> to vector<1x128xf32>
    %105 = vector.broadcast %104 : vector<1x128xf32> to vector<8x128xf32>
    %106 = arith.addf %102, %105 : vector<8x128xf32>
    %107 = math.tanh %106 : vector<8x128xf32>
    %c3_66 = arith.constant 3 : index
    %c0_67 = arith.constant 0 : index
    %c0_68 = arith.constant 0 : index
    %108 = vector.load %arg3[%c3_66, %c0_67, %c0_68] : memref<7x3x128xf32, #tpu.memory_space<vmem>>, vector<1x3x128xf32>
    %109 = vector.shape_cast %108 : vector<1x3x128xf32> to vector<3x128xf32>
    %cst_69 = arith.constant dense<0.000000e+00> : vector<8x3xf32>
    %110 = tpu.matmul %107, %109, %cst_69 {dimension_numbers = #tpu.dot_dimension_numbers<[1], [1], [0], [0], [0, 0, 1, 0], [], []>} : vector<8x128xf32>, vector<3x128xf32>, vector<8x3xf32> -> vector<8x3xf32>
    %c3_70 = arith.constant 3 : index
    %c0_71 = arith.constant 0 : index
    %c0_72 = arith.constant 0 : index
    %111 = vector.load %arg4[%c3_70, %c0_71, %c0_72] : memref<7x1x3xf32, #tpu.memory_space<vmem>>, vector<1x1x3xf32>
    %112 = vector.shape_cast %111 : vector<1x1x3xf32> to vector<1x3xf32>
    %113 = vector.broadcast %112 : vector<1x3xf32> to vector<8x3xf32>
    %114 = arith.addf %110, %113 : vector<8x3xf32>
    %cst_73 = arith.constant dense<0xFF800000> : vector<8xf32>
    %115 = vector.multi_reduction <maximumf>, %114, %cst_73 [1] : vector<8x3xf32> to vector<8xf32>
    %116 = vector.shape_cast %115 : vector<8xf32> to vector<8x1xf32>
    %117 = vector.broadcast %116 : vector<8x1xf32> to vector<8x3xf32>
    %118 = arith.subf %114, %117 : vector<8x3xf32>
    %119 = math.exp %118 : vector<8x3xf32>
    %cst_74 = arith.constant dense<0.000000e+00> : vector<8xf32>
    %120 = vector.multi_reduction <add>, %119, %cst_74 [1] : vector<8x3xf32> to vector<8xf32>
    %121 = vector.shape_cast %120 : vector<8xf32> to vector<8x1xf32>
    %122 = math.log %121 : vector<8x1xf32>
    %123 = arith.addf %116, %122 : vector<8x1xf32>
    %124 = vector.broadcast %123 : vector<8x1xf32> to vector<8x3xf32>
    %125 = arith.subf %114, %124 : vector<8x3xf32>
    %126 = arith.addf %96, %125 : vector<8x3xf32>
    %127 = arith.addf %97, %114 : vector<8x3xf32>
    %c4 = arith.constant 4 : index
    %c0_75 = arith.constant 0 : index
    %c0_76 = arith.constant 0 : index
    %128 = vector.load %arg0[%c4, %c0_75, %c0_76] : memref<7x8x128xbf16, #tpu.memory_space<vmem>>, vector<1x8x128xbf16>
    %129 = vector.shape_cast %128 : vector<1x8x128xbf16> to vector<8x128xbf16>
    %c4_77 = arith.constant 4 : index
    %c0_78 = arith.constant 0 : index
    %c0_79 = arith.constant 0 : index
    %130 = vector.load %arg1[%c4_77, %c0_78, %c0_79] : memref<7x128x128xbf16, #tpu.memory_space<vmem>>, vector<1x128x128xbf16>
    %131 = vector.shape_cast %130 : vector<1x128x128xbf16> to vector<128x128xbf16>
    %cst_80 = arith.constant dense<0.000000e+00> : vector<8x128xf32>
    %132 = tpu.matmul %129, %131, %cst_80 {dimension_numbers = #tpu.dot_dimension_numbers<[1], [0], [0], [1], [0, 0, 1, 1], [], []>} : vector<8x128xbf16>, vector<128x128xbf16>, vector<8x128xf32> -> vector<8x128xf32>
    %c4_81 = arith.constant 4 : index
    %c0_82 = arith.constant 0 : index
    %c0_83 = arith.constant 0 : index
    %133 = vector.load %arg2[%c4_81, %c0_82, %c0_83] : memref<7x1x128xf32, #tpu.memory_space<vmem>>, vector<1x1x128xf32>
    %134 = vector.shape_cast %133 : vector<1x1x128xf32> to vector<1x128xf32>
    %135 = vector.broadcast %134 : vector<1x128xf32> to vector<8x128xf32>
    %136 = arith.addf %132, %135 : vector<8x128xf32>
    %137 = math.tanh %136 : vector<8x128xf32>
    %c4_84 = arith.constant 4 : index
    %c0_85 = arith.constant 0 : index
    %c0_86 = arith.constant 0 : index
    %138 = vector.load %arg3[%c4_84, %c0_85, %c0_86] : memref<7x3x128xf32, #tpu.memory_space<vmem>>, vector<1x3x128xf32>
    %139 = vector.shape_cast %138 : vector<1x3x128xf32> to vector<3x128xf32>
    %cst_87 = arith.constant dense<0.000000e+00> : vector<8x3xf32>
    %140 = tpu.matmul %137, %139, %cst_87 {dimension_numbers = #tpu.dot_dimension_numbers<[1], [1], [0], [0], [0, 0, 1, 0], [], []>} : vector<8x128xf32>, vector<3x128xf32>, vector<8x3xf32> -> vector<8x3xf32>
    %c4_88 = arith.constant 4 : index
    %c0_89 = arith.constant 0 : index
    %c0_90 = arith.constant 0 : index
    %141 = vector.load %arg4[%c4_88, %c0_89, %c0_90] : memref<7x1x3xf32, #tpu.memory_space<vmem>>, vector<1x1x3xf32>
    %142 = vector.shape_cast %141 : vector<1x1x3xf32> to vector<1x3xf32>
    %143 = vector.broadcast %142 : vector<1x3xf32> to vector<8x3xf32>
    %144 = arith.addf %140, %143 : vector<8x3xf32>
    %cst_91 = arith.constant dense<0xFF800000> : vector<8xf32>
    %145 = vector.multi_reduction <maximumf>, %144, %cst_91 [1] : vector<8x3xf32> to vector<8xf32>
    %146 = vector.shape_cast %145 : vector<8xf32> to vector<8x1xf32>
    %147 = vector.broadcast %146 : vector<8x1xf32> to vector<8x3xf32>
    %148 = arith.subf %144, %147 : vector<8x3xf32>
    %149 = math.exp %148 : vector<8x3xf32>
    %cst_92 = arith.constant dense<0.000000e+00> : vector<8xf32>
    %150 = vector.multi_reduction <add>, %149, %cst_92 [1] : vector<8x3xf32> to vector<8xf32>
    %151 = vector.shape_cast %150 : vector<8xf32> to vector<8x1xf32>
    %152 = math.log %151 : vector<8x1xf32>
    %153 = arith.addf %146, %152 : vector<8x1xf32>
    %154 = vector.broadcast %153 : vector<8x1xf32> to vector<8x3xf32>
    %155 = arith.subf %144, %154 : vector<8x3xf32>
    %156 = arith.addf %126, %155 : vector<8x3xf32>
    %157 = arith.addf %127, %144 : vector<8x3xf32>
    %c5 = arith.constant 5 : index
    %c0_93 = arith.constant 0 : index
    %c0_94 = arith.constant 0 : index
    %158 = vector.load %arg0[%c5, %c0_93, %c0_94] : memref<7x8x128xbf16, #tpu.memory_space<vmem>>, vector<1x8x128xbf16>
    %159 = vector.shape_cast %158 : vector<1x8x128xbf16> to vector<8x128xbf16>
    %c5_95 = arith.constant 5 : index
    %c0_96 = arith.constant 0 : index
    %c0_97 = arith.constant 0 : index
    %160 = vector.load %arg1[%c5_95, %c0_96, %c0_97] : memref<7x128x128xbf16, #tpu.memory_space<vmem>>, vector<1x128x128xbf16>
    %161 = vector.shape_cast %160 : vector<1x128x128xbf16> to vector<128x128xbf16>
    %cst_98 = arith.constant dense<0.000000e+00> : vector<8x128xf32>
    %162 = tpu.matmul %159, %161, %cst_98 {dimension_numbers = #tpu.dot_dimension_numbers<[1], [0], [0], [1], [0, 0, 1, 1], [], []>} : vector<8x128xbf16>, vector<128x128xbf16>, vector<8x128xf32> -> vector<8x128xf32>
    %c5_99 = arith.constant 5 : index
    %c0_100 = arith.constant 0 : index
    %c0_101 = arith.constant 0 : index
    %163 = vector.load %arg2[%c5_99, %c0_100, %c0_101] : memref<7x1x128xf32, #tpu.memory_space<vmem>>, vector<1x1x128xf32>
    %164 = vector.shape_cast %163 : vector<1x1x128xf32> to vector<1x128xf32>
    %165 = vector.broadcast %164 : vector<1x128xf32> to vector<8x128xf32>
    %166 = arith.addf %162, %165 : vector<8x128xf32>
    %167 = math.tanh %166 : vector<8x128xf32>
    %c5_102 = arith.constant 5 : index
    %c0_103 = arith.constant 0 : index
    %c0_104 = arith.constant 0 : index
    %168 = vector.load %arg3[%c5_102, %c0_103, %c0_104] : memref<7x3x128xf32, #tpu.memory_space<vmem>>, vector<1x3x128xf32>
    %169 = vector.shape_cast %168 : vector<1x3x128xf32> to vector<3x128xf32>
    %cst_105 = arith.constant dense<0.000000e+00> : vector<8x3xf32>
    %170 = tpu.matmul %167, %169, %cst_105 {dimension_numbers = #tpu.dot_dimension_numbers<[1], [1], [0], [0], [0, 0, 1, 0], [], []>} : vector<8x128xf32>, vector<3x128xf32>, vector<8x3xf32> -> vector<8x3xf32>
    %c5_106 = arith.constant 5 : index
    %c0_107 = arith.constant 0 : index
    %c0_108 = arith.constant 0 : index
    %171 = vector.load %arg4[%c5_106, %c0_107, %c0_108] : memref<7x1x3xf32, #tpu.memory_space<vmem>>, vector<1x1x3xf32>
    %172 = vector.shape_cast %171 : vector<1x1x3xf32> to vector<1x3xf32>
    %173 = vector.broadcast %172 : vector<1x3xf32> to vector<8x3xf32>
    %174 = arith.addf %170, %173 : vector<8x3xf32>
    %cst_109 = arith.constant dense<0xFF800000> : vector<8xf32>
    %175 = vector.multi_reduction <maximumf>, %174, %cst_109 [1] : vector<8x3xf32> to vector<8xf32>
    %176 = vector.shape_cast %175 : vector<8xf32> to vector<8x1xf32>
    %177 = vector.broadcast %176 : vector<8x1xf32> to vector<8x3xf32>
    %178 = arith.subf %174, %177 : vector<8x3xf32>
    %179 = math.exp %178 : vector<8x3xf32>
    %cst_110 = arith.constant dense<0.000000e+00> : vector<8xf32>
    %180 = vector.multi_reduction <add>, %179, %cst_110 [1] : vector<8x3xf32> to vector<8xf32>
    %181 = vector.shape_cast %180 : vector<8xf32> to vector<8x1xf32>
    %182 = math.log %181 : vector<8x1xf32>
    %183 = arith.addf %176, %182 : vector<8x1xf32>
    %184 = vector.broadcast %183 : vector<8x1xf32> to vector<8x3xf32>
    %185 = arith.subf %174, %184 : vector<8x3xf32>
    %186 = arith.addf %156, %185 : vector<8x3xf32>
    %187 = arith.addf %157, %174 : vector<8x3xf32>
    %c6 = arith.constant 6 : index
    %c0_111 = arith.constant 0 : index
    %c0_112 = arith.constant 0 : index
    %188 = vector.load %arg0[%c6, %c0_111, %c0_112] : memref<7x8x128xbf16, #tpu.memory_space<vmem>>, vector<1x8x128xbf16>
    %189 = vector.shape_cast %188 : vector<1x8x128xbf16> to vector<8x128xbf16>
    %c6_113 = arith.constant 6 : index
    %c0_114 = arith.constant 0 : index
    %c0_115 = arith.constant 0 : index
    %190 = vector.load %arg1[%c6_113, %c0_114, %c0_115] : memref<7x128x128xbf16, #tpu.memory_space<vmem>>, vector<1x128x128xbf16>
    %191 = vector.shape_cast %190 : vector<1x128x128xbf16> to vector<128x128xbf16>
    %cst_116 = arith.constant dense<0.000000e+00> : vector<8x128xf32>
    %192 = tpu.matmul %189, %191, %cst_116 {dimension_numbers = #tpu.dot_dimension_numbers<[1], [0], [0], [1], [0, 0, 1, 1], [], []>} : vector<8x128xbf16>, vector<128x128xbf16>, vector<8x128xf32> -> vector<8x128xf32>
    %c6_117 = arith.constant 6 : index
    %c0_118 = arith.constant 0 : index
    %c0_119 = arith.constant 0 : index
    %193 = vector.load %arg2[%c6_117, %c0_118, %c0_119] : memref<7x1x128xf32, #tpu.memory_space<vmem>>, vector<1x1x128xf32>
    %194 = vector.shape_cast %193 : vector<1x1x128xf32> to vector<1x128xf32>
    %195 = vector.broadcast %194 : vector<1x128xf32> to vector<8x128xf32>
    %196 = arith.addf %192, %195 : vector<8x128xf32>
    %197 = math.tanh %196 : vector<8x128xf32>
    %c6_120 = arith.constant 6 : index
    %c0_121 = arith.constant 0 : index
    %c0_122 = arith.constant 0 : index
    %198 = vector.load %arg3[%c6_120, %c0_121, %c0_122] : memref<7x3x128xf32, #tpu.memory_space<vmem>>, vector<1x3x128xf32>
    %199 = vector.shape_cast %198 : vector<1x3x128xf32> to vector<3x128xf32>
    %cst_123 = arith.constant dense<0.000000e+00> : vector<8x3xf32>
    %200 = tpu.matmul %197, %199, %cst_123 {dimension_numbers = #tpu.dot_dimension_numbers<[1], [1], [0], [0], [0, 0, 1, 0], [], []>} : vector<8x128xf32>, vector<3x128xf32>, vector<8x3xf32> -> vector<8x3xf32>
    %c6_124 = arith.constant 6 : index
    %c0_125 = arith.constant 0 : index
    %c0_126 = arith.constant 0 : index
    %201 = vector.load %arg4[%c6_124, %c0_125, %c0_126] : memref<7x1x3xf32, #tpu.memory_space<vmem>>, vector<1x1x3xf32>
    %202 = vector.shape_cast %201 : vector<1x1x3xf32> to vector<1x3xf32>
    %203 = vector.broadcast %202 : vector<1x3xf32> to vector<8x3xf32>
    %204 = arith.addf %200, %203 : vector<8x3xf32>
    %cst_127 = arith.constant dense<0xFF800000> : vector<8xf32>
    %205 = vector.multi_reduction <maximumf>, %204, %cst_127 [1] : vector<8x3xf32> to vector<8xf32>
    %206 = vector.shape_cast %205 : vector<8xf32> to vector<8x1xf32>
    %207 = vector.broadcast %206 : vector<8x1xf32> to vector<8x3xf32>
    %208 = arith.subf %204, %207 : vector<8x3xf32>
    %209 = math.exp %208 : vector<8x3xf32>
    %cst_128 = arith.constant dense<0.000000e+00> : vector<8xf32>
    %210 = vector.multi_reduction <add>, %209, %cst_128 [1] : vector<8x3xf32> to vector<8xf32>
    %211 = vector.shape_cast %210 : vector<8xf32> to vector<8x1xf32>
    %212 = math.log %211 : vector<8x1xf32>
    %213 = arith.addf %206, %212 : vector<8x1xf32>
    %214 = vector.broadcast %213 : vector<8x1xf32> to vector<8x3xf32>
    %215 = arith.subf %204, %214 : vector<8x3xf32>
    %216 = arith.addf %186, %215 : vector<8x3xf32>
    %217 = arith.addf %187, %204 : vector<8x3xf32>
    %cst_129 = arith.constant 0.000000e+00 : f32
    %218 = vector.broadcast %cst_129 : f32 to vector<8x3xf32>
    %219 = arith.subf %218, %5 : vector<8x3xf32>
    %220 = arith.mulf %219, %216 : vector<8x3xf32>
    %221 = vector.shape_cast %220 : vector<8x3xf32> to vector<1x8x3xf32>
    %cst_130 = arith.constant dense<0.000000e+00> : vector<1xf32>
    %222 = vector.multi_reduction <add>, %221, %cst_130 [1, 2] : vector<1x8x3xf32> to vector<1xf32>
    %223 = vector.shape_cast %222 : vector<1xf32> to vector<1x1x1xf32>
    %224 = vector.extract %223[0, 0, 0] : f32 from vector<1x1x1xf32>
    %cst_131 = arith.constant 8.000000e+00 : f32
    %225 = arith.divf %224, %cst_131 : f32
    %c0_132 = arith.constant 0 : index
    %226 = memref.load %arg6[%c0_132] : memref<1xf32, #tpu.memory_space<smem>>
    memref.store %225, %arg6[%c0_132] : memref<1xf32, #tpu.memory_space<smem>>
    %cst_133 = arith.constant 7.000000e+00 : f32
    %227 = vector.broadcast %cst_133 : f32 to vector<8x3xf32>
    %228 = arith.divf %217, %227 : vector<8x3xf32>
    %c0_134 = arith.constant 0 : index
    %c0_135 = arith.constant 0 : index
    %229 = vector.load %arg7[%c0_134, %c0_135] : memref<8x3xf32, #tpu.memory_space<vmem>>, vector<8x3xf32>
    tpu.vector_store %arg7[%c0_134, %c0_135], %228 {strides = array<i32>} : memref<8x3xf32, #tpu.memory_space<vmem>>, vector<8x3xf32>,
    return
  }
}

</mosaic_0001>

<bundles_post_ra>
// kernel: asba_heads_forward.1
= control target key start
LH: loop header
LB: loop body
LE: loop exit
PB: predicated region body
PF: predicated region fallthrough
CT: control target
= control target key end

     0   :  { %13 = vsyncpa [#allocation3], 0  ;;  %s1632_s0 = inlined_call_operand.vmem [shape: bf16[7,8,128], index: 0, kind: input, shape index: {}]   ;;  %s1633_s1 = inlined_call_operand.hbm [shape: bf16[7,128,128], index: 1, kind: input, shape index: {}]   ;;  %s1634_s2 = inlined_call_operand.vmem [shape: f32[7,1,128], index: 2, kind: input, shape index: {}]   ;;  %s1635_s3 = inlined_call_operand.vmem [shape: f32[7,3,128], index: 3, kind: input, shape index: {}]   ;;  %s1636_s4 = inlined_call_operand.vmem [shape: f32[7,1,3], index: 4, kind: input, shape index: {}]   ;;  %s1637_s5 = inlined_call_operand.vmem [shape: s32[8,1], index: 5, kind: input, shape index: {}]   ;;  %s1638_s6 = inlined_call_operand.hbm [shape: f32[1], index: 6, kind: output, shape index: {0}]   ;;  %s1639_s7 = inlined_call_operand.vmem [shape: f32[8,3], index: 7, kind: output, shape index: {1}]  }
   0x1   :  { %14 = vsyncpa [#allocation4], 0  ;;  %s21_s26 = sshll.u32 %s1633_s1, 4  ;;  %s1414_s27 = smov [#allocation2]   ;;  %s22_s26 = int_to_ptr.hbm [resolvable:$true] %s21_s26 }
   0x2   :  { %s23_s28 = sshll.u32 %s1414_s27, 4  ;;  %s1415_s29 = smov 64   ;;  %s24_s28 = int_to_ptr.vmem [resolvable:$true] %s23_s28 }
   0x3   :  { %s1416_s30 = smov 4  }
   0x4   :  { %29 = dma.hbm_to_vmem [thread:$0]  %s22_s26, 7168, %s24_s28, [#allocation3], %s1415_s29, %s1415_s29, %s1416_s30  }
   0x5   :  { %1410 = dma.done.wait [#allocation3], 7168  }
   0x6   :  { %1411 = vsyncadd [#allocation3], 4294960128  ;;  %v1251_v0 = vld [vmem:[#allocation2 + $0x38] sm:$0xff]  ;;  %v1250_v2 = vld [vmem:[#allocation2 + $0x30] sm:$0xff]  ;;  %vm159_vm0 = vcmask 23552   ;;  %s980_s15 = sshll.u32 %s1638_s6, 4  ;;  %s981_s15 = int_to_ptr.hbm [resolvable:$true] %s980_s15 }
   0x7   :  { %v1259_v1 = vld [vmem:[#allocation2 + $0x78] sm:$0xff]  ;;  %120 = vmatpush.bf16.msra.mxu0 %v1251_v0  ;;  %v1258_v3 = vld [vmem:[#allocation2 + $0x70] sm:$0xff]  ;;  %v1249_v4 = vld [vmem:[#allocation2 + $0x28] sm:$0xff]  ;;  %s1421_s18 = smov [#allocation5]  }
   0x8   :  { %247 = vmatpush.bf16.msra.mxu2 %v1259_v1  ;;  %v1257_v5 = vld [vmem:[#allocation2 + $0x68] sm:$0xff]  ;;  %v134_v6 = vld [vmem:[%s1635_s3] sm:$0x7]  ;;  %v1267_v7 = vld [vmem:[#allocation2 + $0xb8] sm:$0xff] }
   0x9   :  { %154 = vmatpush.xpose.msra.mxu1 %v134_v6  ;;  %v1248_v8 = vld [vmem:[#allocation2 + $0x20] sm:$0xff]  ;;  %v1266_v10 = vld [vmem:[#allocation2 + $0xb0] sm:$0xff]  ;;  %v1265_v11 = vld [vmem:[#allocation2 + $0xa8] sm:$0xff] }
   0xa   :  { %v1256_v9 = vld [vmem:[#allocation2 + $0x60] sm:$0xff]  ;;  %v1247_v12 = vld [vmem:[#allocation2 + $0x18] sm:$0xff]  ;;  %v1246_v15 = vld [vmem:[#allocation2 + $0x10] sm:$0xff] }
   0xb   :  { %121 = vmatpush.bf16.msra.mxu0 %v1250_v2  ;;  %v1255_v13 = vld [vmem:[#allocation2 + $0x58] sm:$0xff]  ;;  %v1264_v14 = vld [vmem:[#allocation2 + $0xa0] sm:$0xff]  ;;  %v1254_v16 = vld [vmem:[#allocation2 + $0x50] sm:$0xff] }
   0xc   :  { %248 = vmatpush.bf16.msra.mxu2 %v1258_v3  ;;  %v1245_v17 = vld [vmem:[#allocation2 + $0x8] sm:$0xff]  ;;  %v1244_v19 = vld [vmem:[#allocation2] sm:$0xff]  ;;  %v1263_v23 = vld [vmem:[#allocation2 + $0x98] sm:$0xff] }
   0xd   :  { %375 = vmatpush.bf16.msrb.mxu1 %v1267_v7  ;;  %v1253_v18 = vld [vmem:[#allocation2 + $0x48] sm:$0xff]  ;;  %v1252_v20 = vld [vmem:[#allocation2 + $0x40] sm:$0xff]  ;;  %v1262_v24 = vld [vmem:[#allocation2 + $0x90] sm:$0xff] }
   0xe   :  { %v51_v21 = vld [vmem:[%s1632_s0] sm:$0xf]  ;;  %v1028_v22 = vld [vmem:[%s1632_s0 + $0x4] sm:$0xf]  ;;  %v1261_v25 = vld [vmem:[#allocation2 + $0x88] sm:$0xff] }
   0xf   :  { %122 = vmatpush.bf16.msra.mxu0 %v1249_v4  ;;  %v1062_v26 = vld [vmem:[%s1635_s3 + $0x4] sm:$0x7]  ;;  %v1098_v28 = vld [vmem:[%s1635_s3 + $0x8] sm:$0x7]  ;;  %v1275_v29 = vld [vmem:[#allocation2 + $0xf8] sm:$0xff] }
  0x10   :  { %249 = vmatpush.bf16.msra.mxu2 %v1257_v5  ;;  %v1260_v27 = vld [vmem:[#allocation2 + $0x80] sm:$0xff]  ;;  %411 = vmatpush.xpose.msra.mxu3 %v1098_v28  ;;  %v1274_v30 = vld [vmem:[#allocation2 + $0xf0] sm:$0xff]  ;;  %v1273_v31 = vld [vmem:[#allocation2 + $0xe8] sm:$0xff] }
  0x11   :  { %376 = vmatpush.bf16.msrb.mxu1 %v1266_v10  ;;  %v1314_v32 = vld [vmem:[%s1634_s2] ss:$0 sm:$0xff]  ;;  %v1315_v35 = vld [vmem:[%s1634_s2 + $0x1] ss:$0 sm:$0xff]  ;;  %v1064_v42 = vld [vmem:[%s1632_s0 + $0x8] sm:$0xf] }
  0x12   :  { %v1272_v43 = vld [vmem:[#allocation2 + $0xe0] sm:$0xff]  ;;  %v1283_v44 = vld [vmem:[#allocation2 + $0x138] sm:$0xff]  ;;  %v1282_v46 = vld [vmem:[#allocation2 + $0x130] sm:$0xff] }
  0x13   :  { %123 = vmatpush.bf16.msra.mxu0 %v1248_v8  ;;  %v1271_v45 = vld [vmem:[#allocation2 + $0xd8] sm:$0xff]  ;;  %v1270_v47 = vld [vmem:[#allocation2 + $0xd0] sm:$0xff]  ;;  %v1281_v48 = vld [vmem:[#allocation2 + $0x128] sm:$0xff] }
  0x14   :  { %250 = vmatpush.bf16.msra.mxu2 %v1256_v9  ;;  %503 = vmatpush.bf16.msrb.mxu3 %v1275_v29  ;;  %v1269_v49 = vld [vmem:[#allocation2 + $0xc8] sm:$0xff]  ;;  %v1280_v50 = vld [vmem:[#allocation2 + $0x120] sm:$0xff]  ;;  %v1279_v52 = vld [vmem:[#allocation2 + $0x118] sm:$0xff] }
  0x15   :  { %377 = vmatpush.bf16.msrb.mxu1 %v1265_v11  ;;  %v1268_v51 = vld [vmem:[#allocation2 + $0xc0] sm:$0xff]  ;;  %v1278_v53 = vld [vmem:[#allocation2 + $0x110] sm:$0xff]  ;;  %v1299_v54 = vld [vmem:[#allocation2 + $0x1b8] sm:$0xff] }
  0x16   :  { %v1277_v55 = vld [vmem:[#allocation2 + $0x108] sm:$0xff]  ;;  %v1298_v56 = vld [vmem:[#allocation2 + $0x1b0] sm:$0xff]  ;;  %v1276_v57 = vld [vmem:[#allocation2 + $0x100] sm:$0xff] }
  0x17   :  { %124 = vmatpush.bf16.msra.mxu0 %v1247_v12  ;;  %v1316_v58 = vld [vmem:[%s1636_s4] ss:$0 sm:$0xff]  ;;  %v1297_v59 = vld [vmem:[#allocation2 + $0x1a8] sm:$0xff]  ;;  %v1136_v60 = vld [vmem:[%s1632_s0 + $0x10] sm:$0xf] }
  0x18   :  { %251 = vmatpush.bf16.msra.mxu2 %v1255_v13  ;;  %504 = vmatpush.bf16.msrb.mxu3 %v1274_v30  ;;  %v1296_v0 = vld [vmem:[#allocation2 + $0x1a0] sm:$0xff]  ;;  %v1295_v2 = vld [vmem:[#allocation2 + $0x198] sm:$0xff]  ;;  %v1294_v5 = vld [vmem:[#allocation2 + $0x190] sm:$0xff] }
  0x19   :  { %378 = vmatpush.bf16.msrb.mxu1 %v1264_v14  ;;  %v1318_v1 = vld [vmem:[%s1634_s2 + $0x2] ss:$0 sm:$0xff]  ;;  %v1291_v6 = vld [vmem:[#allocation2 + $0x178] sm:$0xff]  ;;  %v1293_v7 = vld [vmem:[#allocation2 + $0x188] sm:$0xff] }
  0x1a   :  { %v1292_v10 = vld [vmem:[#allocation2 + $0x180] sm:$0xff]  ;;  %v1290_v11 = vld [vmem:[#allocation2 + $0x170] sm:$0xff]  ;;  %v1208_v12 = vld [vmem:[%s1632_s0 + $0x18] sm:$0xf] }
  0x1b   :  { %125 = vmatpush.bf16.msra.mxu0 %v1246_v15  ;;  %v1100_v13 = vld [vmem:[%s1632_s0 + $0xc] sm:$0xf]  ;;  %v1288_v15 = vld [vmem:[#allocation2 + $0x160] sm:$0xff] }
  0x1c   :  { %252 = vmatpush.bf16.msra.mxu2 %v1254_v16  ;;  %505 = vmatpush.bf16.msrb.mxu3 %v1273_v31  ;;  %v1289_v14 = vld [vmem:[#allocation2 + $0x168] sm:$0xff]  ;;  %v1287_v16 = vld [vmem:[#allocation2 + $0x158] sm:$0xff]  ;;  %v1319_v29 = vld [vmem:[%s1636_s4 + $0x2] ss:$0 sm:$0xff] }
  0x1d   :  { %379 = vmatpush.bf16.msrb.mxu1 %v1263_v23  ;;  %v1170_v23 = vld [vmem:[%s1635_s3 + $0x10] sm:$0x7] }
  0x1f   :  { %126 = vmatpush.bf16.msra.mxu0 %v1245_v17  ;;  %v1286_v17 = vld [vmem:[#allocation2 + $0x150] sm:$0xff] }
  0x20   :  { %253 = vmatpush.bf16.msra.mxu2 %v1253_v18  ;;  %506 = vmatpush.bf16.msrb.mxu3 %v1272_v43  ;;  %v1285_v18 = vld [vmem:[#allocation2 + $0x148] sm:$0xff] }
  0x21   :  { %380 = vmatpush.bf16.msrb.mxu1 %v1262_v24  ;;  %v1317_v24 = vld [vmem:[%s1636_s4 + $0x1] ss:$0 sm:$0xff] }
  0x23   :  { %127 = vmatpush.bf16.msra.mxu0 %v1244_v19  ;;  %v1284_v19 = vld [vmem:[#allocation2 + $0x140] sm:$0xff] }
  0x24   :  { %254 = vmatpush.bf16.msra.mxu2 %v1252_v20  ;;  %507 = vmatpush.bf16.msrb.mxu3 %v1271_v45  ;;  %v1172_v20 = vld [vmem:[%s1632_s0 + $0x14] sm:$0xf]  ;;  %v1322_v45 = vld [vmem:[%s1634_s2 + $0x5] ss:$0 sm:$0xff] }
  0x25   :  { %381 = vmatpush.bf16.msrb.mxu1 %v1261_v25 }
  0x26   :  { %128 = vmatmul.bf16.vlgmr.msra.gmra.mxu0 %v51_v21  ;;  %v1134_v21 = vld [vmem:[%s1635_s3 + $0xc] sm:$0x7] }
  0x27   :  { %255 = vmatmul.bf16.vlgmr.msra.gmra.mxu2 %v1028_v22  ;;  %283 = vmatpush.xpose.msrb.mxu0 %v1062_v26 }
  0x28   :  { %631 = vmatpush.bf16.msrb.mxu2 %v1283_v44  ;;  %508 = vmatpush.bf16.msrb.mxu3 %v1270_v47  ;;  %v1242_v44 = vld [vmem:[%s1635_s3 + $0x18] sm:$0x7] }
  0x29   :  { %382 = vmatpush.bf16.msrb.mxu1 %v1260_v27 }
  0x2b   :  { %539 = vmatpush.xpose.msra.mxu0 %v1134_v21 }
  0x2c   :  { %632 = vmatpush.bf16.msrb.mxu2 %v1282_v46  ;;  %509 = vmatpush.bf16.msrb.mxu3 %v1269_v49 }
  0x30   :  { %633 = vmatpush.bf16.msrb.mxu2 %v1281_v48  ;;  %510 = vmatpush.bf16.msrb.mxu3 %v1268_v51  ;;  %v1323_v48 = vld [vmem:[%s1634_s2 + $0x6] ss:$0 sm:$0xff] }
  0x34   :  { %634 = vmatpush.bf16.msrb.mxu2 %v1280_v50 }
  0x38   :  { %635 = vmatpush.bf16.msrb.mxu2 %v1279_v52 }
  0x3c   :  { %636 = vmatpush.bf16.msrb.mxu2 %v1278_v53 }
  0x40   :  { %637 = vmatpush.bf16.msrb.mxu2 %v1277_v55  ;;  %v1324_v55 = vld [vmem:[%s1636_s4 + $0x3] ss:$0 sm:$0xff] }
  0x44   :  { %638 = vmatpush.bf16.msrb.mxu2 %v1276_v57 }
  0x47   :  { %639 = vmatmul.bf16.vlgmr.msrb.gmra.mxu2 %v1136_v60  ;;  %v1325_v60 = vld [vmem:[%s1636_s4 + $0x4] ss:$0 sm:$0xff] }
  0xa3   :  { %v129_v33 = vpop.f32.mrf.mxu0 }
  0xa4   :  { %v130_v34 = vadd.f32 %v1314_v32, %v129_v33 }
  0xa6   :  { %1328 = vtanh.f32 %v130_v34  ;;  %v1320_v34 = vld [vmem:[%s1634_s2 + $0x3] ss:$0 sm:$0xff] }
  0xaa   :  { %v256_v36 = vpop.f32.mrf.mxu2 }
  0xab   :  { %v257_v37 = vadd.f32 %v1315_v35, %v256_v36  ;;  %v131_v38 = vpop.f32.mrf.mxu0 }
  0xac   :  { %v1329_v39 = vpop.eup %1328  ;;  %v1321_v38 = vld [vmem:[%s1634_s2 + $0x4] ss:$0 sm:$0xff] }
  0xad   :  { %1330 = vtanh.f32 %v257_v37  ;;  %155 = vmatmul.f32.vlgmr.msra.gmra.mxu1 %v1329_v39 }
  0xae   :  { %887 = vmatpush.bf16.msra.mxu1 %v1299_v54 }
  0xb2   :  { %v258_v40 = vpop.f32.mrf.mxu2  ;;  %888 = vmatpush.bf16.msra.mxu1 %v1298_v56 }
  0xb3   :  { %v1331_v41 = vpop.eup %1330 }
  0xb4   :  { %284 = vmatmul.f32.vlgmr.msrb.gmra.mxu0 %v1331_v41  ;;  %v1206_v41 = vld [vmem:[%s1635_s3 + $0x14] sm:$0x7] }
  0xb5   :  { %383 = vmatmul.bf16.vlgmr.msrb.gmra.mxu1 %v1064_v42  ;;  %667 = vmatpush.xpose.msrb.mxu0 %v1170_v23 }
  0xb6   :  { %889 = vmatpush.bf16.msra.mxu1 %v1297_v59 }
  0xba   :  { %890 = vmatpush.bf16.msra.mxu1 %v1296_v0 }
  0xbe   :  { %891 = vmatpush.bf16.msra.mxu1 %v1295_v2 }
  0xc2   :  { %892 = vmatpush.bf16.msra.mxu1 %v1294_v5 }
  0xc6   :  { %893 = vmatpush.bf16.msra.mxu1 %v1293_v7 }
  0xca   :  { %894 = vmatpush.bf16.msra.mxu1 %v1292_v10  ;;  %v640_v22 = vpop.f32.mrf.mxu2 }
  0xcb   :  { %v641_v39 = vadd.f32 %v1321_v38, %v640_v22 }
  0xcd   :  { %895 = vmatmul.bf16.vlgmr.msra.gmra.mxu1 %v1208_v12 }
  0xd2   :  { %v642_v27 = vpop.f32.mrf.mxu2 }
 0x12a   :  { %v156_v61 = vpop.f32.mrf.mxu1 }
 0x12b   :  { %v1495_v62 = vadd.f32 %v1316_v58, %v156_v61 }
 0x12d   :  { %v160_v63 = vsel %vm159_vm0, %v1495_v62, -inf }
 0x12e   :  { %161 = vmax.xlane.f32.xlu0 %v160_v63 }
 0x131   :  { %v285_v25 = vpop.f32.mrf.mxu0 }
 0x132   :  { %v384_v3 = vpop.f32.mrf.mxu1  ;;  %v1520_v26 = vadd.f32 %v1317_v24, %v285_v25 }
 0x133   :  { %v385_v4 = vadd.f32 %v1318_v1, %v384_v3  ;;  %v1417_v1 = vmov 7.0  }
 0x134   :  { %v288_v28 = vsel %vm159_vm0, %v1520_v26, -inf }
 0x135   :  { %1332 = vtanh.f32 %v385_v4 }
 0x136   :  { %289 = vmax.xlane.f32.xlu0 %v288_v28 }
 0x13a   :  { %v386_v8 = vpop.f32.mrf.mxu1 }
 0x13b   :  { %v1333_v9 = vpop.eup %1332  ;;  %v1326_v8 = vld [vmem:[%s1636_s4 + $0x5] ss:$0 sm:$0xff] }
 0x13c   :  { %412 = vmatmul.f32.vlgmr.msra.gmra.mxu3 %v1333_v9 }
 0x13d   :  { %759 = vmatpush.bf16.msra.mxu3 %v1291_v6 }
 0x141   :  { %760 = vmatpush.bf16.msra.mxu3 %v1290_v11 }
 0x144   :  { %511 = vmatmul.bf16.vlgmr.msrb.gmra.mxu3 %v1100_v13  ;;  %v302_v13 = vadd.f32 %v1520_v26, %v1495_v62 }
 0x145   :  { %761 = vmatpush.bf16.msra.mxu3 %v1289_v14 }
 0x149   :  { %762 = vmatpush.bf16.msra.mxu3 %v1288_v15 }
 0x14a   :  { %v896_v31 = vpop.f32.mrf.mxu1 }
 0x14b   :  { %v897_v49 = vadd.f32 %v1323_v48, %v896_v31 }
 0x14d   :  { %763 = vmatpush.bf16.msra.mxu3 %v1287_v16 }
 0x151   :  { %764 = vmatpush.bf16.msra.mxu3 %v1286_v17 }
 0x152   :  { %v898_v36 = vpop.f32.mrf.mxu1 }
 0x155   :  { %765 = vmatpush.bf16.msra.mxu3 %v1285_v18 }
 0x159   :  { %766 = vmatpush.bf16.msra.mxu3 %v1284_v19 }
 0x15c   :  { %767 = vmatmul.bf16.vlgmr.msra.gmra.mxu3 %v1172_v20  ;;  %v1327_v20 = vld [vmem:[%s1636_s4 + $0x6] ss:$0 sm:$0xff] }
 0x1a1   :  { %v1549_v53 = vpop.xlane.xlu0 %161 }
 0x1a2   :  { %v163_v54 = vsub.f32 %v1495_v62, %v1549_v53 }
 0x1a4   :  { %v164_v56 = vmul.f32 1.442695, %v163_v54 }
 0x1a9   :  { %v1568_v5 = vpop.xlane.xlu0 %289 }
 0x1aa   :  { %v291_v6 = vsub.f32 %v1520_v26, %v1568_v5 }
 0x1ac   :  { %v292_v9 = vmul.f32 1.442695, %v291_v6 }
 0x1bf   :  { %v413_v30 = vpop.f32.mrf.mxu3 }
 0x1c0   :  { %v1527_v32 = vadd.f32 %v1319_v29, %v413_v30 }
 0x1c2   :  { %v416_v33 = vsel %vm159_vm0, %v1527_v32, -inf  ;;  %v430_v17 = vadd.f32 %v1527_v32, %v302_v13 }
 0x1c3   :  { %417 = vmax.xlane.f32.xlu1 %v416_v33 }
 0x1c7   :  { %v512_v35 = vpop.f32.mrf.mxu3 }
 0x1c8   :  { %v513_v37 = vadd.f32 %v1320_v34, %v512_v35 }
 0x1ca   :  { %1334 = vtanh.f32 %v513_v37 }
 0x1cb   :  { %1336 = vtanh.f32 %v641_v39 }
 0x1cf   :  { %v514_v40 = vpop.f32.mrf.mxu3 }
 0x1d0   :  { %v1335_v42 = vpop.eup %1334 }
 0x1d1   :  { %540 = vmatmul.f32.vlgmr.msra.gmra.mxu0 %v1335_v42  ;;  %v1337_v43 = vpop.eup %1336 }
 0x1d2   :  { %795 = vmatpush.xpose.msra.mxu0 %v1206_v41 }
 0x1d9   :  { %668 = vmatmul.f32.vlgmr.msrb.gmra.mxu0 %v1337_v43 }
 0x1da   :  { %923 = vmatpush.xpose.msrb.mxu0 %v1242_v44 }
 0x1df   :  { %v768_v46 = vpop.f32.mrf.mxu3 }
 0x1e0   :  { %v769_v47 = vadd.f32 %v1322_v45, %v768_v46 }
 0x1e2   :  { %1338 = vtanh.f32 %v769_v47  ;;  %v1418_v47 = vmov 0  }
 0x1e3   :  { %1340 = vtanh.f32 %v897_v49  ;;  %1312 = vset.pattern.permute.xlu2 %v1418_v47  ;;  %1313 = vset.pattern.permute.xlu0 %v1418_v47 }
 0x1e4   :  { %1342 = vpow2.f32 %v164_v56 }
 0x1e5   :  { %1344 = vrcp.f32 %v1417_v1 }
 0x1e6   :  { %1346 = vpow2.f32 %v292_v9 }
 0x1e7   :  { %v770_v50 = vpop.f32.mrf.mxu3 }
 0x1e8   :  { %v1339_v51 = vpop.eup %1338 }
 0x1e9   :  { %796 = vmatmul.f32.vlgmr.msra.gmra.mxu0 %v1339_v51  ;;  %v1341_v52 = vpop.eup %1340 }
 0x1ea   :  { %v1343_v61 = vpop.eup %1342 }
 0x1eb   :  { %v166_v3 = vsel %vm159_vm0, %v1343_v61, 0.0  ;;  %v1345_v4 = vpop.eup %1344 }
 0x1ec   :  { %v967_v7 = vmul.f32 7.0, %v1345_v4  ;;  %vm971_vm1 = vweird.f32 %v1345_v4  ;;  %v1347_v24 = vpop.eup %1346 }
 0x1ed   :  { %v294_v33 = vsel %vm159_vm0, %v1347_v24, 0.0 }
 0x1ee   :  { %v968_v10 = vsub.f32 1.0, %v967_v7 }
 0x1f0   :  { %v969_v16 = vmul.f32 %v1345_v4, %v968_v10 }
 0x1f1   :  { %924 = vmatmul.f32.vlgmr.msrb.gmra.mxu0 %v1341_v52 }
 0x1f2   :  { %v970_v22 = vadd.f32 %v1345_v4, %v969_v16 }
 0x1f4   :  { %v972_v29 = vsel %vm971_vm1, %v1345_v4, %v970_v22 }
 0x236   :  { %v1575_v11 = vpop.xlane.xlu1 %417 }
 0x237   :  { %v419_v15 = vsub.f32 %v1527_v32, %v1575_v11 }
 0x239   :  { %v420_v21 = vmul.f32 1.442695, %v419_v15 }
 0x23b   :  { %1348 = vpow2.f32 %v420_v21  ;;  %v42_v21 = vlaneseq }
 0x241   :  { %v1349_v35 = vpop.eup %1348 }
 0x242   :  { %v422_v36 = vsel %vm159_vm0, %v1349_v35, 0.0 }
 0x24e   :  { %v541_v57 = vpop.f32.mrf.mxu0 }
 0x24f   :  { %v1556_v58 = vadd.f32 %v1324_v55, %v541_v57  ;;  %v44_v57 = vld [vmem:[%s1637_s5] sm:$0xff] }
 0x251   :  { %v544_v59 = vsel %vm159_vm0, %v1556_v58, -inf  ;;  %v558_v19 = vadd.f32 %v1556_v58, %v430_v17 }
 0x252   :  { %545 = vmax.xlane.f32.xlu1 %v544_v59 }
 0x256   :  { %v669_v63 = vpop.f32.mrf.mxu0 }
 0x257   :  { %v1563_v0 = vadd.f32 %v1325_v60, %v669_v63 }
 0x259   :  { %v672_v2 = vsel %vm159_vm0, %v1563_v0, -inf  ;;  %v686_v23 = vadd.f32 %v1563_v0, %v558_v19 }
 0x25a   :  { %673 = vmax.xlane.f32.xlu2 %v672_v2  ;;  %167 = vadd.xlane.f32.xlu1 %v166_v3 }
 0x266   :  { %v797_v12 = vpop.f32.mrf.mxu0 }
 0x267   :  { %v1579_v14 = vadd.f32 %v1326_v8, %v797_v12 }
 0x269   :  { %v800_v18 = vsel %vm159_vm0, %v1579_v14, -inf  ;;  %v814_v27 = vadd.f32 %v1579_v14, %v686_v23 }
 0x26a   :  { %801 = vmax.xlane.f32.xlu2 %v800_v18 }
 0x26e   :  { %v925_v25 = vpop.f32.mrf.mxu0 }
 0x26f   :  { %v1592_v28 = vadd.f32 %v1327_v20, %v925_v25 }
 0x271   :  { %v942_v30 = vadd.f32 %v1592_v28, %v814_v27  ;;  %v928_v31 = vsel %vm159_vm0, %v1592_v28, -inf }
 0x272   :  { %929 = vmax.xlane.f32.xlu0 %v928_v31  ;;  %295 = vadd.xlane.f32.xlu2 %v294_v33  ;;  %v43_v31 = vand.u32 127, %v42_v21 }
 0x273   :  { %v973_v34 = vmul.f32 %v972_v29, %v942_v30 }
 0x275   :  { %974 = vst.msk [vmem:[%s1639_s7] sm:$0xff] %vm159_vm0, %v973_v34 }
 0x27a   :  { %423 = vadd.xlane.f32.xlu0 %v422_v36 }
 0x2c5   :  { %v546_v37 = vpop.xlane.xlu1 %545 }
 0x2c6   :  { %v547_v38 = vsub.f32 %v1556_v58, %v546_v37 }
 0x2c8   :  { %v548_v39 = vmul.f32 1.442695, %v547_v38 }
 0x2ca   :  { %1350 = vpow2.f32 %v548_v39 }
 0x2cd   :  { %v1604_v40 = vpop.xlane.xlu2 %673  ;;  %v168_v61 = vpop.xlane.xlu1 %167 }
 0x2ce   :  { %v675_v41 = vsub.f32 %v1563_v0, %v1604_v40 }
 0x2d0   :  { %v1351_v42 = vpop.eup %1350  ;;  %v676_v43 = vmul.f32 1.442695, %v675_v41 }
 0x2d1   :  { %v550_v44 = vsel %vm159_vm0, %v1351_v42, 0.0 }
 0x2d2   :  { %1352 = vpow2.f32 %v676_v43  ;;  %551 = vadd.xlane.f32.xlu1 %v550_v44 }
 0x2d8   :  { %v1353_v45 = vpop.eup %1352 }
 0x2d9   :  { %v678_v46 = vsel %vm159_vm0, %v1353_v45, 0.0 }
 0x2da   :  { %679 = vadd.xlane.f32.xlu2 %v678_v46 }
 0x2dd   :  { %v802_v48 = vpop.xlane.xlu2 %801 }
 0x2de   :  { %v803_v49 = vsub.f32 %v1579_v14, %v802_v48 }
 0x2e0   :  { %v804_v50 = vmul.f32 1.442695, %v803_v49 }
 0x2e2   :  { %1354 = vpow2.f32 %v804_v50 }
 0x2e5   :  { %v930_v51 = vpop.xlane.xlu0 %929  ;;  %v296_v63 = vpop.xlane.xlu2 %295 }
 0x2e6   :  { %v931_v52 = vsub.f32 %v1592_v28, %v930_v51 }
 0x2e8   :  { %v1355_v54 = vpop.eup %1354  ;;  %v932_v55 = vmul.f32 1.442695, %v931_v52 }
 0x2e9   :  { %v806_v56 = vsel %vm159_vm0, %v1355_v54, 0.0 }
 0x2ea   :  { %1356 = vpow2.f32 %v932_v55  ;;  %807 = vadd.xlane.f32.xlu0 %v806_v56 }
 0x2eb   :  { %1358 = vlog2.f32 %v296_v63 }
 0x2ec   :  { %1360 = vlog2.f32 %v168_v61 }
 0x2ed   :  { %v424_v1 = vpop.xlane.xlu0 %423 }
 0x2ee   :  { %1362 = vlog2.f32 %v424_v1 }
 0x2f0   :  { %v1357_v59 = vpop.eup %1356 }
 0x2f1   :  { %v934_v60 = vsel %vm159_vm0, %v1357_v59, 0.0  ;;  %v1359_v4 = vpop.eup %1358 }
 0x2f2   :  { %935 = vadd.xlane.f32.xlu1 %v934_v60  ;;  %46 = vperm.xlu2 %1312, %v44_v57   ;;  %v1361_v6 = vpop.eup %1360  ;;  %v298_v8 = vmul.f32 0.6931472, %v1359_v4 }
 0x2f3   :  { %v170_v12 = vmul.f32 0.6931472, %v1361_v6 }
 0x2f4   :  { %v1363_v7 = vpop.eup %1362  ;;  %v299_v16 = vadd.f32 %v298_v8, %v1568_v5 }
 0x2f5   :  { %v426_v13 = vmul.f32 0.6931472, %v1363_v7  ;;  %v171_v18 = vadd.f32 %v170_v12, %v1549_v53 }
 0x2f6   :  { %v300_v23 = vsub.f32 %v1520_v26, %v299_v16 }
 0x2f7   :  { %v427_v19 = vadd.f32 %v426_v13, %v1575_v11  ;;  %v172_v29 = vsub.f32 %v1495_v62, %v171_v18  ;;  %v1419_v62 = vmov 0.0  }
 0x2f9   :  { %v428_v30 = vsub.f32 %v1527_v32, %v427_v19  ;;  %v301_v53 = vadd.f32 %v300_v23, %v172_v29 }
 0x2fb   :  { %v429_v35 = vadd.f32 %v428_v30, %v301_v53 }
 0x345   :  { %v552_v2 = vpop.xlane.xlu1 %551 }
 0x346   :  { %1364 = vlog2.f32 %v552_v2 }
 0x34c   :  { %v1365_v10 = vpop.eup %1364 }
 0x34d   :  { %v680_v3 = vpop.xlane.xlu2 %679  ;;  %v554_v17 = vmul.f32 0.6931472, %v1365_v10 }
 0x34e   :  { %1366 = vlog2.f32 %v680_v3 }
 0x34f   :  { %v555_v24 = vadd.f32 %v554_v17, %v546_v37 }
 0x351   :  { %v556_v11 = vsub.f32 %v1556_v58, %v555_v24 }
 0x353   :  { %v557_v37 = vadd.f32 %v556_v11, %v429_v35 }
 0x354   :  { %v1367_v15 = vpop.eup %1366 }
 0x355   :  { %v682_v20 = vmul.f32 0.6931472, %v1367_v15  ;;  %v47_v33 = vpop.permute.xlu2 %46 }
 0x356   :  { %vm48_vm2 = vcmp.eq.s32.totalorder %v43_v31, %v47_v33 }
 0x357   :  { %v683_v5 = vadd.f32 %v682_v20, %v1604_v40  ;;  %v995_v41 = vsel %vm48_vm2, 1.0, %v1419_v62 }
 0x358   :  { %v943_v43 = vsub.f32 0.0, %v995_v41 }
 0x359   :  { %v684_v36 = vsub.f32 %v1563_v0, %v683_v5  ;;  %v1420_v0 = vmov 8.0  }
 0x35b   :  { %v685_v32 = vadd.f32 %v684_v36, %v557_v37 }
 0x35d   :  { %v808_v9 = vpop.xlane.xlu0 %807 }
 0x35e   :  { %1368 = vlog2.f32 %v808_v9 }
 0x364   :  { %v1369_v22 = vpop.eup %1368 }
 0x365   :  { %v810_v25 = vmul.f32 0.6931472, %v1369_v22  ;;  %v936_v27 = vpop.xlane.xlu1 %935 }
 0x366   :  { %1370 = vlog2.f32 %v936_v27 }
 0x367   :  { %v811_v34 = vadd.f32 %v810_v25, %v802_v48  ;;  %1372 = vrcp.f32 %v1420_v0 }
 0x369   :  { %v812_v38 = vsub.f32 %v1579_v14, %v811_v34 }
 0x36b   :  { %v813_v44 = vadd.f32 %v812_v38, %v685_v32 }
 0x36c   :  { %v1371_v26 = vpop.eup %1370 }
 0x36d   :  { %v938_v39 = vmul.f32 0.6931472, %v1371_v26  ;;  %v1373_v47 = vpop.eup %1372 }
 0x36e   :  { %v956_v48 = vmul.f32 8.0, %v1373_v47  ;;  %vm960_vm3 = vweird.f32 %v1373_v47 }
 0x36f   :  { %v939_v42 = vadd.f32 %v938_v39, %v930_v51 }
 0x370   :  { %v957_v49 = vsub.f32 1.0, %v956_v48 }
 0x371   :  { %v940_v40 = vsub.f32 %v1592_v28, %v939_v42 }
 0x372   :  { %v958_v54 = vmul.f32 %v1373_v47, %v957_v49 }
 0x373   :  { %v941_v45 = vadd.f32 %v940_v40, %v813_v44 }
 0x374   :  { %v959_v56 = vadd.f32 %v1373_v47, %v958_v54 }
 0x375   :  { %v944_v58 = vmul.f32 %v943_v43, %v941_v45 }
 0x376   :  { %v961_v59 = vsel %vm960_vm3, %v1373_v47, %v959_v56 }
 0x377   :  { %v945_v46 = vsel %vm159_vm0, %v944_v58, 0.0 }
 0x378   :  { %946 = vadd.xlane.f32.xlu0 %v945_v46 }
 0x3eb   :  { %v947_v14 = vpop.xlane.xlu0 %946 }
 0x3ec   :  { %v948_v50 = vrot.slane %v947_v14, 4 }
 0x3ee   :  { %v949_v52 = vadd.f32 %v948_v50, %v947_v14 }
 0x3f0   :  { %v950_v55 = vrot.slane %v949_v52, 2 }
 0x3f2   :  { %v951_v51 = vadd.f32 %v950_v55, %v949_v52 }
 0x3f4   :  { %v952_v28 = vrot.slane %v951_v51, 1 }
 0x3f6   :  { %v953_v57 = vadd.f32 %v952_v28, %v951_v51 }
 0x3f8   :  { %1300 = vpush %v953_v57 }
 0x3f9   :  { %1302 = vpush %v961_v59 }
 0x429   :  { %s1301_s16 = spop %1300 }
 0x42a   :  { %s1303_s0 = spop %1302 }
 0x42b   :  { %s963_s17 = smul.f32 %s1303_s0, %s1301_s16 }
 0x42d   :  { %965 = sst [smem:[#allocation5]] %s963_s17 }
 0x42e   :  { %983 = dma.smem_to_hbm %s1421_s18, 16, %s981_s15, [#allocation4]  }
 0x42f   :  { %1412 = dma.done.wait [#allocation4], 16  }
 0x430   :  { %1413 = vsyncadd [#allocation4], 4294967280 }
 0x431   :  { %992 = sfence }
 0x432   :  { %993 = vsyncpa [#allocation3], 1 }
 0x433   :  { %994 = vsyncpa [#allocation4], 1 }

</bundles_post_ra>
